<compile_context>
chip_gen: v7x
topology: tpu7x:2x2x1
jax: 0.10.0
libtpu: 0.0.40
codegen_flags: <defaults>
</compile_context>

<pallas_src>
import functools

import numpy as np
import jax
import jax.numpy as jnp
from jax.experimental import pallas as pl
from jax.experimental.pallas import tpu as pltpu


def tempo_attention_kernel(x_ref, wq_ref, wk_ref, wv_ref, bq_ref, bk_ref, bv_ref,
                           out_ref, agg_ref, att_ref, *,
                           heads, dim, block_n, seq, operand_dtype):
    """One block of `block_n` batch elements per grid step.

    x_ref   : (Bn, T, D)          VMEM
    w*_ref  : (D, heads*dim)      VMEM, pre-transposed (scale folded into wq)
    b*_ref  : (1, heads*dim)      VMEM, f32 (scale folded into bq)
    out_ref : (Bn, T, heads*dim)
    agg_ref : (Bn, 1, heads*dim)
    att_ref : (Bn, heads, T, T)
    """
    Bn, T, D = block_n, seq, dim
    HD = heads * dim
    f32 = jnp.float32

    # --- Full-width projections: one (Bn*T, D) @ (D, HD) matmul each (lane-dense,
    # single MXU op per projection instead of 3*heads tiny per-head matmuls). ---
    x2 = x_ref[...].astype(operand_dtype).reshape(Bn * T, D)
    wq = wq_ref[...].astype(operand_dtype)
    wk = wk_ref[...].astype(operand_dtype)
    wv = wv_ref[...].astype(operand_dtype)

    q_all = (jnp.dot(x2, wq, preferred_element_type=f32)
             + bq_ref[...].astype(f32)).reshape(Bn, T, HD)   # scale already folded in
    k_all = (jnp.dot(x2, wk, preferred_element_type=f32)
             + bk_ref[...].astype(f32)).reshape(Bn, T, HD)
    v_all = (jnp.dot(x2, wv, preferred_element_type=f32)
             + bv_ref[...].astype(f32)).reshape(Bn, T, HD)

    inv_t = 1.0 / float(T)

    # heads is small and static -> unrolled; per-head work is batched over Bn.
    for h in range(heads):
        hs = pl.ds(h * dim, dim)
        q_h = q_all[:, :, h * dim:(h + 1) * dim].astype(operand_dtype)   # (Bn, T, dim)
        k_h = k_all[:, :, h * dim:(h + 1) * dim].astype(operand_dtype)
        v_h = v_all[:, :, h * dim:(h + 1) * dim].astype(operand_dtype)

        # Scores are already scaled by 1/sqrt(dim) (folded into wq/bq in the wrapper).
        s = jnp.einsum('btd,bsd->bts', q_h, k_h,
                       preferred_element_type=f32)                       # (Bn, T, T)
        s_max = jnp.max(s, axis=-1, keepdims=True)
        p = jnp.exp(s - s_max)
        # Approximate reciprocal -> EUP slot (otherwise idle here); ~1e-3-level error.
        p = p * pl.reciprocal(jnp.sum(p, axis=-1, keepdims=True), approx=True)

        o_h = jnp.einsum('bts,bsd->btd', p.astype(operand_dtype), v_h,
                         preferred_element_type=f32)                     # (Bn, T, dim)

        # Direct slice stores -- no concatenate/stack, no extra VMEM copies.
        # NOTE: att keeps its natural (N, heads, T, T) layout; at T=8 the (T,T) tile is
        # tiny and the fully lane-dense (N, heads*T*T) variant would need a per-head
        # sublane->lane (T,T)->(T*T,) relayout costing about what the masked stores it
        # removes cost.  Revisit (flash-style key tiling + flat lane-dense writes) if T
        # grows -- also required to stay inside v7x's 64 MiB VMEM for large T.
        att_ref[:, h, :, :] = p.astype(att_ref.dtype)
        out_ref[:, :, hs] = o_h.astype(out_ref.dtype)
        agg_ref[:, :, hs] = (jnp.sum(o_h, axis=1, keepdims=True) * inv_t
                             ).astype(agg_ref.dtype)


def _choose_block_n(N, T, max_block=64):
    """Largest divisor of N (<= max_block) keeping >= 2 grid steps (v7x has 2 TCs),
    preferring Bn*T a multiple of 128 (v5e MXU M-dim occupancy)."""
    divs = [b for b in range(1, min(N, max_block) + 1)
            if N % b == 0 and (N == 1 or N // b >= 2)]
    if not divs:
        return 1
    aligned = [b for b in divs if (b * T) % 128 == 0]
    return max(aligned) if aligned else max(divs)


def tempo_attention(x, wq, wk, wv, bq=None, bk=None, bv=None, *,
                    heads, dim, block_n=None, operand_dtype=None):
    """Pallas TempoAttention.forward(x) (attention_mask / attention_weights = None).

    wq/wk/wv: (heads*dim, dim) PyTorch Linear weights; bq/bk/bv: optional (heads*dim,)
    biases (zeros by default, matching init_weights()).
    Returns (out (N,T,heads*dim), out_agg (N,heads*dim), att (N,heads,T,T)).
    """
    # TODO(synk): attention_mask / attention_weights (the None-default optional args)
    # are not plumbed into the kernel; only the mask-free forward path is implemented.
    N, T, D = x.shape
    assert D == dim
    HD = heads * dim
    if operand_dtype is None:
        # Set operand_dtype=jnp.bfloat16 for bf16-native MXU operands (f32 accumulation,
        # f32 softmax) -- biggest win on v5e; f32 default keeps bit-level fidelity.
        operand_dtype = jnp.float32
    if block_n is None:
        block_n = _choose_block_n(N, T)
    assert N % block_n == 0, "block_n must divide N"
    grid = (N // block_n,)

    scale = 1.0 / float(np.sqrt(dim))
    if bq is None:
        bq = jnp.zeros((HD,), x.dtype)
    if bk is None:
        bk = jnp.zeros((HD,), x.dtype)
    if bv is None:
        bv = jnp.zeros((HD,), x.dtype)

    # Pre-transpose weights to (D, HD) and fold the 1/sqrt(dim) scale into the Q
    # projection (weight and bias) so the kernel never transposes or rescales.
    wq_t = (jnp.asarray(wq).T * scale).astype(x.dtype)
    wk_t = jnp.asarray(wk).T.astype(x.dtype)
    wv_t = jnp.asarray(wv).T.astype(x.dtype)
    bq_r = (jnp.asarray(bq) * scale).reshape(1, HD).astype(jnp.float32)
    bk_r = jnp.asarray(bk).reshape(1, HD).astype(jnp.float32)
    bv_r = jnp.asarray(bv).reshape(1, HD).astype(jnp.float32)

    kernel = functools.partial(tempo_attention_kernel, heads=heads, dim=dim,
                               block_n=block_n, seq=T, operand_dtype=operand_dtype)

    # Grid-invariant weight/bias specs.  At (32,128) f32 the extra double-buffer copy
    # is negligible; single-buffer them (pipeline_mode=pl.Buffered(1)) or preload into
    # scratch if D or heads*dim ever grow.
    w_spec = pl.BlockSpec((D, HD), lambda i: (0, 0))
    b_spec = pl.BlockSpec((1, HD), lambda i: (0, 0))

    out, agg, att = pl.pallas_call(
        kernel,
        out_shape=(
            jax.ShapeDtypeStruct((N, T, HD), x.dtype),
            jax.ShapeDtypeStruct((N, 1, HD), x.dtype),
            jax.ShapeDtypeStruct((N, heads, T, T), x.dtype),
        ),
        grid=grid,
        in_specs=[
            pl.BlockSpec((block_n, T, D), lambda i: (i, 0, 0)),
            w_spec, w_spec, w_spec,
            b_spec, b_spec, b_spec,
        ],
        out_specs=(
            pl.BlockSpec((block_n, T, HD), lambda i: (i, 0, 0)),
            pl.BlockSpec((block_n, 1, HD), lambda i: (i, 0, 0)),
            pl.BlockSpec((block_n, heads, T, T), lambda i: (i, 0, 0, 0)),
        ),
        compiler_params=pltpu.CompilerParams(
            dimension_semantics=("parallel",)),   # batch-block axis shards over v7x TCs
    )(x, wq_t, wk_t, wv_t, bq_r, bk_r, bv_r)

    return out, agg[:, 0, :], att


def tempo_attention_ref(x, wq, wk, wv, bq, bk, bv, *, heads, dim):
    """Pure-JAX reference mirroring the PyTorch forward (with biases)."""
    N, T, D = x.shape
    q = (x @ wq.T + bq).reshape(N, T, heads, D).transpose(0, 2, 1, 3)   # (N,H,T,D)
    k = (x @ wk.T + bk).reshape(N, T, heads, D).transpose(0, 2, 3, 1)   # (N,H,D,T)
    v = (x @ wv.T + bv).reshape(N, T, heads, D).transpose(0, 2, 1, 3)   # (N,H,T,D)
    att = jnp.matmul(q, k) / np.sqrt(D)
    att = jax.nn.softmax(att, axis=-1)
    out = jnp.matmul(att, v).transpose(0, 2, 1, 3).reshape(N, T, heads * D)
    out_agg = jnp.mean(out, axis=1)
    return out, out_agg, att


if __name__ == "__main__":
    heads, dim = 4, 32
    HD = heads * dim
    key = jax.random.PRNGKey(0)

    def check(x, wq, wk, wv, bq, bk, bv):
        out, agg, att = jax.block_until_ready(
            tempo_attention(x, wq, wk, wv, bq, bk, bv, heads=heads, dim=dim))
        out_r, agg_r, att_r = tempo_attention_ref(x, wq, wk, wv, bq, bk, bv,
                                                  heads=heads, dim=dim)
        # Tolerance is loose only to cover the EUP approximate-reciprocal softmax
        # denominator (pl.reciprocal(approx=True)); any structural bug would be >> 1e-2.
        np.testing.assert_allclose(np.asarray(out), np.asarray(out_r), rtol=1e-2, atol=1e-2)
        np.testing.assert_allclose(np.asarray(agg), np.asarray(agg_r), rtol=1e-2, atol=1e-2)
        np.testing.assert_allclose(np.asarray(att), np.asarray(att_r), rtol=1e-2, atol=1e-2)
        return out.shape, agg.shape, att.shape

    # Case 1: module init (init.eye_ weights, zero biases), N=2 -> block_n=1, grid=(2,).
    N, T = 2, 8
    x = jax.random.normal(key, (N, T, dim), dtype=jnp.float32)
    eye_w = jnp.eye(HD, dim, dtype=jnp.float32)
    zeros_b = jnp.zeros((HD,), jnp.float32)
    shapes = check(x, eye_w, eye_w, eye_w, zeros_b, zeros_b, zeros_b)
    assert shapes == ((N, T, HD), (N, HD), (N, heads, T, T))

    # Case 2: random weights + nonzero biases, N=8 -> block_n=4, grid=(2,)
    # (exercises the batched-block path and the bias plumbing).
    N2 = 8
    ks = jax.random.split(key, 7)
    x2 = jax.random.normal(ks[0], (N2, T, dim), dtype=jnp.float32)
    wq = 0.1 * jax.random.normal(ks[1], (HD, dim), dtype=jnp.float32)
    wk = 0.1 * jax.random.normal(ks[2], (HD, dim), dtype=jnp.float32)
    wv = 0.1 * jax.random.normal(ks[3], (HD, dim), dtype=jnp.float32)
    bq = 0.1 * jax.random.normal(ks[4], (HD,), dtype=jnp.float32)
    bk = 0.1 * jax.random.normal(ks[5], (HD,), dtype=jnp.float32)
    bv = 0.1 * jax.random.normal(ks[6], (HD,), dtype=jnp.float32)
    check(x2, wq, wk, wv, bq, bk, bv)

    print("KERNEL_OK")
</pallas_src>

<mosaic_0001>
module attributes {stable_mosaic.version = 11 : i64} {
  func.func @tempo_attention_kernel(%arg0: i32, %arg1: memref<1x8x32xf32, #tpu.memory_space<vmem>>, %arg2: memref<32x128xf32, #tpu.memory_space<vmem>>, %arg3: memref<32x128xf32, #tpu.memory_space<vmem>>, %arg4: memref<32x128xf32, #tpu.memory_space<vmem>>, %arg5: memref<1x128xf32, #tpu.memory_space<vmem>>, %arg6: memref<1x128xf32, #tpu.memory_space<vmem>>, %arg7: memref<1x128xf32, #tpu.memory_space<vmem>>, %arg8: memref<1x8x128xf32, #tpu.memory_space<vmem>>, %arg9: memref<1x1x128xf32, #tpu.memory_space<vmem>>, %arg10: memref<1x4x8x8xf32, #tpu.memory_space<vmem>>) attributes {dimension_semantics = [#tpu.dimension_semantics<parallel>], iteration_bounds = array<i64: 2>, scalar_prefetch = 0 : i64, scratch_operands = 0 : i64, tpu.core_type = #tpu.core_type<tc>, window_params = [{transform_indices = @transform_0, window_bounds = array<i64: 1, 8, 32>}, {pipeline_mode = #tpu.pipeline_mode<synchronous>, transform_indices = @transform_1, window_bounds = array<i64: 32, 128>}, {pipeline_mode = #tpu.pipeline_mode<synchronous>, transform_indices = @transform_2, window_bounds = array<i64: 32, 128>}, {pipeline_mode = #tpu.pipeline_mode<synchronous>, transform_indices = @transform_3, window_bounds = array<i64: 32, 128>}, {pipeline_mode = #tpu.pipeline_mode<synchronous>, transform_indices = @transform_4, window_bounds = array<i64: 1, 128>}, {pipeline_mode = #tpu.pipeline_mode<synchronous>, transform_indices = @transform_5, window_bounds = array<i64: 1, 128>}, {pipeline_mode = #tpu.pipeline_mode<synchronous>, transform_indices = @transform_6, window_bounds = array<i64: 1, 128>}, {transform_indices = @transform_7, window_bounds = array<i64: 1, 8, 128>}, {transform_indices = @transform_8, window_bounds = array<i64: 1, 1, 128>}, {transform_indices = @transform_9, window_bounds = array<i64: 1, 4, 8, 8>}]} {
    %c0 = arith.constant 0 : index
    %c0_0 = arith.constant 0 : index
    %c0_1 = arith.constant 0 : index
    %0 = vector.load %arg1[%c0, %c0_0, %c0_1] : memref<1x8x32xf32, #tpu.memory_space<vmem>>, vector<1x8x32xf32>
    %1 = vector.shape_cast %0 : vector<1x8x32xf32> to vector<8x32xf32>
    %c0_2 = arith.constant 0 : index
    %c0_3 = arith.constant 0 : index
    %2 = vector.load %arg2[%c0_2, %c0_3] : memref<32x128xf32, #tpu.memory_space<vmem>>, vector<32x128xf32>
    %c0_4 = arith.constant 0 : index
    %c0_5 = arith.constant 0 : index
    %3 = vector.load %arg3[%c0_4, %c0_5] : memref<32x128xf32, #tpu.memory_space<vmem>>, vector<32x128xf32>
    %c0_6 = arith.constant 0 : index
    %c0_7 = arith.constant 0 : index
    %4 = vector.load %arg4[%c0_6, %c0_7] : memref<32x128xf32, #tpu.memory_space<vmem>>, vector<32x128xf32>
    %cst = arith.constant dense<0.000000e+00> : vector<8x128xf32>
    %5 = tpu.matmul %1, %2, %cst {dimension_numbers = #tpu.dot_dimension_numbers<[1], [0], [0], [1], [0, 0, 1, 1], [], []>} : vector<8x32xf32>, vector<32x128xf32>, vector<8x128xf32> -> vector<8x128xf32>
    %c0_8 = arith.constant 0 : index
    %c0_9 = arith.constant 0 : index
    %6 = vector.load %arg5[%c0_8, %c0_9] : memref<1x128xf32, #tpu.memory_space<vmem>>, vector<1x128xf32>
    %7 = vector.broadcast %6 : vector<1x128xf32> to vector<8x128xf32>
    %8 = arith.addf %5, %7 : vector<8x128xf32>
    %9 = vector.shape_cast %8 : vector<8x128xf32> to vector<1x8x128xf32>
    %cst_10 = arith.constant dense<0.000000e+00> : vector<8x128xf32>
    %10 = tpu.matmul %1, %3, %cst_10 {dimension_numbers = #tpu.dot_dimension_numbers<[1], [0], [0], [1], [0, 0, 1, 1], [], []>} : vector<8x32xf32>, vector<32x128xf32>, vector<8x128xf32> -> vector<8x128xf32>
    %c0_11 = arith.constant 0 : index
    %c0_12 = arith.constant 0 : index
    %11 = vector.load %arg6[%c0_11, %c0_12] : memref<1x128xf32, #tpu.memory_space<vmem>>, vector<1x128xf32>
    %12 = vector.broadcast %11 : vector<1x128xf32> to vector<8x128xf32>
    %13 = arith.addf %10, %12 : vector<8x128xf32>
    %14 = vector.shape_cast %13 : vector<8x128xf32> to vector<1x8x128xf32>
    %cst_13 = arith.constant dense<0.000000e+00> : vector<8x128xf32>
    %15 = tpu.matmul %1, %4, %cst_13 {dimension_numbers = #tpu.dot_dimension_numbers<[1], [0], [0], [1], [0, 0, 1, 1], [], []>} : vector<8x32xf32>, vector<32x128xf32>, vector<8x128xf32> -> vector<8x128xf32>
    %c0_14 = arith.constant 0 : index
    %c0_15 = arith.constant 0 : index
    %16 = vector.load %arg7[%c0_14, %c0_15] : memref<1x128xf32, #tpu.memory_space<vmem>>, vector<1x128xf32>
    %17 = vector.broadcast %16 : vector<1x128xf32> to vector<8x128xf32>
    %18 = arith.addf %15, %17 : vector<8x128xf32>
    %19 = vector.shape_cast %18 : vector<8x128xf32> to vector<1x8x128xf32>
    %20 = vector.extract_strided_slice %9 {offsets = [0, 0, 0], sizes = [1, 8, 32], strides = [1, 1, 1]} : vector<1x8x128xf32> to vector<1x8x32xf32>
    %21 = vector.extract_strided_slice %14 {offsets = [0, 0, 0], sizes = [1, 8, 32], strides = [1, 1, 1]} : vector<1x8x128xf32> to vector<1x8x32xf32>
    %22 = vector.extract_strided_slice %19 {offsets = [0, 0, 0], sizes = [1, 8, 32], strides = [1, 1, 1]} : vector<1x8x128xf32> to vector<1x8x32xf32>
    "tpu.trace_start"() <{level = 10 : i32, message = "btd,bsd->bts"}> : () -> ()
    %cst_16 = arith.constant dense<0.000000e+00> : vector<1x8x8xf32>
    %23 = tpu.matmul %20, %21, %cst_16 {dimension_numbers = #tpu.dot_dimension_numbers<[2], [2], [1], [1], [0, 0, 0, 1, 1, 1], [0], [0]>} : vector<1x8x32xf32>, vector<1x8x32xf32>, vector<1x8x8xf32> -> vector<1x8x8xf32>
    "tpu.trace_stop"() : () -> ()
    %cst_17 = arith.constant dense<0xFF800000> : vector<1x8xf32>
    %24 = vector.multi_reduction <maximumf>, %23, %cst_17 [2] : vector<1x8x8xf32> to vector<1x8xf32>
    %25 = vector.shape_cast %24 : vector<1x8xf32> to vector<1x8x1xf32>
    %26 = vector.broadcast %25 : vector<1x8x1xf32> to vector<1x8x8xf32>
    %27 = arith.subf %23, %26 : vector<1x8x8xf32>
    %28 = math.exp %27 : vector<1x8x8xf32>
    %cst_18 = arith.constant dense<0.000000e+00> : vector<1x8xf32>
    %29 = vector.multi_reduction <add>, %28, %cst_18 [2] : vector<1x8x8xf32> to vector<1x8xf32>
    %30 = vector.shape_cast %29 : vector<1x8xf32> to vector<1x8x1xf32>
    %31 = tpu.reciprocal %30 {approx = true} : vector<1x8x1xf32> -> vector<1x8x1xf32>
    %32 = vector.broadcast %31 : vector<1x8x1xf32> to vector<1x8x8xf32>
    %33 = arith.mulf %28, %32 : vector<1x8x8xf32>
    "tpu.trace_start"() <{level = 10 : i32, message = "bts,bsd->btd"}> : () -> ()
    %cst_19 = arith.constant dense<0.000000e+00> : vector<1x8x32xf32>
    %34 = tpu.matmul %33, %22, %cst_19 {dimension_numbers = #tpu.dot_dimension_numbers<[2], [1], [1], [2], [0, 0, 0, 1, 1, 2], [0], [0]>} : vector<1x8x8xf32>, vector<1x8x32xf32>, vector<1x8x32xf32> -> vector<1x8x32xf32>
    "tpu.trace_stop"() : () -> ()
    %c0_20 = arith.constant 0 : index
    %c0_21 = arith.constant 0 : index
    %c0_22 = arith.constant 0 : index
    %c0_23 = arith.constant 0 : index
    %35 = vector.load %arg10[%c0_20, %c0_21, %c0_22, %c0_23] : memref<1x4x8x8xf32, #tpu.memory_space<vmem>>, vector<1x1x8x8xf32>
    %36 = vector.shape_cast %35 : vector<1x1x8x8xf32> to vector<1x8x8xf32>
    %37 = vector.shape_cast %33 : vector<1x8x8xf32> to vector<1x1x8x8xf32>
    tpu.vector_store %arg10[%c0_20, %c0_21, %c0_22, %c0_23], %37 {strides = array<i32>} : memref<1x4x8x8xf32, #tpu.memory_space<vmem>>, vector<1x1x8x8xf32>,
    %c0_24 = arith.constant 0 : index
    %c0_25 = arith.constant 0 : index
    %c0_26 = arith.constant 0 : index
    %38 = vector.load %arg8[%c0_24, %c0_25, %c0_26] : memref<1x8x128xf32, #tpu.memory_space<vmem>>, vector<1x8x32xf32>
    tpu.vector_store %arg8[%c0_24, %c0_25, %c0_26], %34 {strides = array<i32>} : memref<1x8x128xf32, #tpu.memory_space<vmem>>, vector<1x8x32xf32>,
    %cst_27 = arith.constant dense<0.000000e+00> : vector<1x32xf32>
    %39 = vector.multi_reduction <add>, %34, %cst_27 [1] : vector<1x8x32xf32> to vector<1x32xf32>
    %40 = vector.shape_cast %39 : vector<1x32xf32> to vector<1x1x32xf32>
    %cst_28 = arith.constant 1.250000e-01 : f32
    %41 = vector.broadcast %cst_28 : f32 to vector<1x1x32xf32>
    %42 = arith.mulf %40, %41 : vector<1x1x32xf32>
    %c0_29 = arith.constant 0 : index
    %c0_30 = arith.constant 0 : index
    %c0_31 = arith.constant 0 : index
    %43 = vector.load %arg9[%c0_29, %c0_30, %c0_31] : memref<1x1x128xf32, #tpu.memory_space<vmem>>, vector<1x1x32xf32>
    tpu.vector_store %arg9[%c0_29, %c0_30, %c0_31], %42 {strides = array<i32>} : memref<1x1x128xf32, #tpu.memory_space<vmem>>, vector<1x1x32xf32>,
    %44 = vector.extract_strided_slice %9 {offsets = [0, 0, 32], sizes = [1, 8, 32], strides = [1, 1, 1]} : vector<1x8x128xf32> to vector<1x8x32xf32>
    %45 = vector.extract_strided_slice %14 {offsets = [0, 0, 32], sizes = [1, 8, 32], strides = [1, 1, 1]} : vector<1x8x128xf32> to vector<1x8x32xf32>
    %46 = vector.extract_strided_slice %19 {offsets = [0, 0, 32], sizes = [1, 8, 32], strides = [1, 1, 1]} : vector<1x8x128xf32> to vector<1x8x32xf32>
    "tpu.trace_start"() <{level = 10 : i32, message = "btd,bsd->bts"}> : () -> ()
    %cst_32 = arith.constant dense<0.000000e+00> : vector<1x8x8xf32>
    %47 = tpu.matmul %44, %45, %cst_32 {dimension_numbers = #tpu.dot_dimension_numbers<[2], [2], [1], [1], [0, 0, 0, 1, 1, 1], [0], [0]>} : vector<1x8x32xf32>, vector<1x8x32xf32>, vector<1x8x8xf32> -> vector<1x8x8xf32>
    "tpu.trace_stop"() : () -> ()
    %cst_33 = arith.constant dense<0xFF800000> : vector<1x8xf32>
    %48 = vector.multi_reduction <maximumf>, %47, %cst_33 [2] : vector<1x8x8xf32> to vector<1x8xf32>
    %49 = vector.shape_cast %48 : vector<1x8xf32> to vector<1x8x1xf32>
    %50 = vector.broadcast %49 : vector<1x8x1xf32> to vector<1x8x8xf32>
    %51 = arith.subf %47, %50 : vector<1x8x8xf32>
    %52 = math.exp %51 : vector<1x8x8xf32>
    %cst_34 = arith.constant dense<0.000000e+00> : vector<1x8xf32>
    %53 = vector.multi_reduction <add>, %52, %cst_34 [2] : vector<1x8x8xf32> to vector<1x8xf32>
    %54 = vector.shape_cast %53 : vector<1x8xf32> to vector<1x8x1xf32>
    %55 = tpu.reciprocal %54 {approx = true} : vector<1x8x1xf32> -> vector<1x8x1xf32>
    %56 = vector.broadcast %55 : vector<1x8x1xf32> to vector<1x8x8xf32>
    %57 = arith.mulf %52, %56 : vector<1x8x8xf32>
    "tpu.trace_start"() <{level = 10 : i32, message = "bts,bsd->btd"}> : () -> ()
    %cst_35 = arith.constant dense<0.000000e+00> : vector<1x8x32xf32>
    %58 = tpu.matmul %57, %46, %cst_35 {dimension_numbers = #tpu.dot_dimension_numbers<[2], [1], [1], [2], [0, 0, 0, 1, 1, 2], [0], [0]>} : vector<1x8x8xf32>, vector<1x8x32xf32>, vector<1x8x32xf32> -> vector<1x8x32xf32>
    "tpu.trace_stop"() : () -> ()
    %c0_36 = arith.constant 0 : index
    %c1 = arith.constant 1 : index
    %c0_37 = arith.constant 0 : index
    %c0_38 = arith.constant 0 : index
    %59 = vector.load %arg10[%c0_36, %c1, %c0_37, %c0_38] : memref<1x4x8x8xf32, #tpu.memory_space<vmem>>, vector<1x1x8x8xf32>
    %60 = vector.shape_cast %59 : vector<1x1x8x8xf32> to vector<1x8x8xf32>
    %61 = vector.shape_cast %57 : vector<1x8x8xf32> to vector<1x1x8x8xf32>
    tpu.vector_store %arg10[%c0_36, %c1, %c0_37, %c0_38], %61 {strides = array<i32>} : memref<1x4x8x8xf32, #tpu.memory_space<vmem>>, vector<1x1x8x8xf32>,
    %c0_39 = arith.constant 0 : index
    %c0_40 = arith.constant 0 : index
    %c32 = arith.constant 32 : index
    %62 = vector.load %arg8[%c0_39, %c0_40, %c32] : memref<1x8x128xf32, #tpu.memory_space<vmem>>, vector<1x8x32xf32>
    tpu.vector_store %arg8[%c0_39, %c0_40, %c32], %58 {strides = array<i32>} : memref<1x8x128xf32, #tpu.memory_space<vmem>>, vector<1x8x32xf32>,
    %cst_41 = arith.constant dense<0.000000e+00> : vector<1x32xf32>
    %63 = vector.multi_reduction <add>, %58, %cst_41 [1] : vector<1x8x32xf32> to vector<1x32xf32>
    %64 = vector.shape_cast %63 : vector<1x32xf32> to vector<1x1x32xf32>
    %cst_42 = arith.constant 1.250000e-01 : f32
    %65 = vector.broadcast %cst_42 : f32 to vector<1x1x32xf32>
    %66 = arith.mulf %64, %65 : vector<1x1x32xf32>
    %c0_43 = arith.constant 0 : index
    %c0_44 = arith.constant 0 : index
    %c32_45 = arith.constant 32 : index
    %67 = vector.load %arg9[%c0_43, %c0_44, %c32_45] : memref<1x1x128xf32, #tpu.memory_space<vmem>>, vector<1x1x32xf32>
    tpu.vector_store %arg9[%c0_43, %c0_44, %c32_45], %66 {strides = array<i32>} : memref<1x1x128xf32, #tpu.memory_space<vmem>>, vector<1x1x32xf32>,
    %68 = vector.extract_strided_slice %9 {offsets = [0, 0, 64], sizes = [1, 8, 32], strides = [1, 1, 1]} : vector<1x8x128xf32> to vector<1x8x32xf32>
    %69 = vector.extract_strided_slice %14 {offsets = [0, 0, 64], sizes = [1, 8, 32], strides = [1, 1, 1]} : vector<1x8x128xf32> to vector<1x8x32xf32>
    %70 = vector.extract_strided_slice %19 {offsets = [0, 0, 64], sizes = [1, 8, 32], strides = [1, 1, 1]} : vector<1x8x128xf32> to vector<1x8x32xf32>
    "tpu.trace_start"() <{level = 10 : i32, message = "btd,bsd->bts"}> : () -> ()
    %cst_46 = arith.constant dense<0.000000e+00> : vector<1x8x8xf32>
    %71 = tpu.matmul %68, %69, %cst_46 {dimension_numbers = #tpu.dot_dimension_numbers<[2], [2], [1], [1], [0, 0, 0, 1, 1, 1], [0], [0]>} : vector<1x8x32xf32>, vector<1x8x32xf32>, vector<1x8x8xf32> -> vector<1x8x8xf32>
    "tpu.trace_stop"() : () -> ()
    %cst_47 = arith.constant dense<0xFF800000> : vector<1x8xf32>
    %72 = vector.multi_reduction <maximumf>, %71, %cst_47 [2] : vector<1x8x8xf32> to vector<1x8xf32>
    %73 = vector.shape_cast %72 : vector<1x8xf32> to vector<1x8x1xf32>
    %74 = vector.broadcast %73 : vector<1x8x1xf32> to vector<1x8x8xf32>
    %75 = arith.subf %71, %74 : vector<1x8x8xf32>
    %76 = math.exp %75 : vector<1x8x8xf32>
    %cst_48 = arith.constant dense<0.000000e+00> : vector<1x8xf32>
    %77 = vector.multi_reduction <add>, %76, %cst_48 [2] : vector<1x8x8xf32> to vector<1x8xf32>
    %78 = vector.shape_cast %77 : vector<1x8xf32> to vector<1x8x1xf32>
    %79 = tpu.reciprocal %78 {approx = true} : vector<1x8x1xf32> -> vector<1x8x1xf32>
    %80 = vector.broadcast %79 : vector<1x8x1xf32> to vector<1x8x8xf32>
    %81 = arith.mulf %76, %80 : vector<1x8x8xf32>
    "tpu.trace_start"() <{level = 10 : i32, message = "bts,bsd->btd"}> : () -> ()
    %cst_49 = arith.constant dense<0.000000e+00> : vector<1x8x32xf32>
    %82 = tpu.matmul %81, %70, %cst_49 {dimension_numbers = #tpu.dot_dimension_numbers<[2], [1], [1], [2], [0, 0, 0, 1, 1, 2], [0], [0]>} : vector<1x8x8xf32>, vector<1x8x32xf32>, vector<1x8x32xf32> -> vector<1x8x32xf32>
    "tpu.trace_stop"() : () -> ()
    %c0_50 = arith.constant 0 : index
    %c2 = arith.constant 2 : index
    %c0_51 = arith.constant 0 : index
    %c0_52 = arith.constant 0 : index
    %83 = vector.load %arg10[%c0_50, %c2, %c0_51, %c0_52] : memref<1x4x8x8xf32, #tpu.memory_space<vmem>>, vector<1x1x8x8xf32>
    %84 = vector.shape_cast %83 : vector<1x1x8x8xf32> to vector<1x8x8xf32>
    %85 = vector.shape_cast %81 : vector<1x8x8xf32> to vector<1x1x8x8xf32>
    tpu.vector_store %arg10[%c0_50, %c2, %c0_51, %c0_52], %85 {strides = array<i32>} : memref<1x4x8x8xf32, #tpu.memory_space<vmem>>, vector<1x1x8x8xf32>,
    %c0_53 = arith.constant 0 : index
    %c0_54 = arith.constant 0 : index
    %c64 = arith.constant 64 : index
    %86 = vector.load %arg8[%c0_53, %c0_54, %c64] : memref<1x8x128xf32, #tpu.memory_space<vmem>>, vector<1x8x32xf32>
    tpu.vector_store %arg8[%c0_53, %c0_54, %c64], %82 {strides = array<i32>} : memref<1x8x128xf32, #tpu.memory_space<vmem>>, vector<1x8x32xf32>,
    %cst_55 = arith.constant dense<0.000000e+00> : vector<1x32xf32>
    %87 = vector.multi_reduction <add>, %82, %cst_55 [1] : vector<1x8x32xf32> to vector<1x32xf32>
    %88 = vector.shape_cast %87 : vector<1x32xf32> to vector<1x1x32xf32>
    %cst_56 = arith.constant 1.250000e-01 : f32
    %89 = vector.broadcast %cst_56 : f32 to vector<1x1x32xf32>
    %90 = arith.mulf %88, %89 : vector<1x1x32xf32>
    %c0_57 = arith.constant 0 : index
    %c0_58 = arith.constant 0 : index
    %c64_59 = arith.constant 64 : index
    %91 = vector.load %arg9[%c0_57, %c0_58, %c64_59] : memref<1x1x128xf32, #tpu.memory_space<vmem>>, vector<1x1x32xf32>
    tpu.vector_store %arg9[%c0_57, %c0_58, %c64_59], %90 {strides = array<i32>} : memref<1x1x128xf32, #tpu.memory_space<vmem>>, vector<1x1x32xf32>,
    %92 = vector.extract_strided_slice %9 {offsets = [0, 0, 96], sizes = [1, 8, 32], strides = [1, 1, 1]} : vector<1x8x128xf32> to vector<1x8x32xf32>
    %93 = vector.extract_strided_slice %14 {offsets = [0, 0, 96], sizes = [1, 8, 32], strides = [1, 1, 1]} : vector<1x8x128xf32> to vector<1x8x32xf32>
    %94 = vector.extract_strided_slice %19 {offsets = [0, 0, 96], sizes = [1, 8, 32], strides = [1, 1, 1]} : vector<1x8x128xf32> to vector<1x8x32xf32>
    "tpu.trace_start"() <{level = 10 : i32, message = "btd,bsd->bts"}> : () -> ()
    %cst_60 = arith.constant dense<0.000000e+00> : vector<1x8x8xf32>
    %95 = tpu.matmul %92, %93, %cst_60 {dimension_numbers = #tpu.dot_dimension_numbers<[2], [2], [1], [1], [0, 0, 0, 1, 1, 1], [0], [0]>} : vector<1x8x32xf32>, vector<1x8x32xf32>, vector<1x8x8xf32> -> vector<1x8x8xf32>
    "tpu.trace_stop"() : () -> ()
    %cst_61 = arith.constant dense<0xFF800000> : vector<1x8xf32>
    %96 = vector.multi_reduction <maximumf>, %95, %cst_61 [2] : vector<1x8x8xf32> to vector<1x8xf32>
    %97 = vector.shape_cast %96 : vector<1x8xf32> to vector<1x8x1xf32>
    %98 = vector.broadcast %97 : vector<1x8x1xf32> to vector<1x8x8xf32>
    %99 = arith.subf %95, %98 : vector<1x8x8xf32>
    %100 = math.exp %99 : vector<1x8x8xf32>
    %cst_62 = arith.constant dense<0.000000e+00> : vector<1x8xf32>
    %101 = vector.multi_reduction <add>, %100, %cst_62 [2] : vector<1x8x8xf32> to vector<1x8xf32>
    %102 = vector.shape_cast %101 : vector<1x8xf32> to vector<1x8x1xf32>
    %103 = tpu.reciprocal %102 {approx = true} : vector<1x8x1xf32> -> vector<1x8x1xf32>
    %104 = vector.broadcast %103 : vector<1x8x1xf32> to vector<1x8x8xf32>
    %105 = arith.mulf %100, %104 : vector<1x8x8xf32>
    "tpu.trace_start"() <{level = 10 : i32, message = "bts,bsd->btd"}> : () -> ()
    %cst_63 = arith.constant dense<0.000000e+00> : vector<1x8x32xf32>
    %106 = tpu.matmul %105, %94, %cst_63 {dimension_numbers = #tpu.dot_dimension_numbers<[2], [1], [1], [2], [0, 0, 0, 1, 1, 2], [0], [0]>} : vector<1x8x8xf32>, vector<1x8x32xf32>, vector<1x8x32xf32> -> vector<1x8x32xf32>
    "tpu.trace_stop"() : () -> ()
    %c0_64 = arith.constant 0 : index
    %c3 = arith.constant 3 : index
    %c0_65 = arith.constant 0 : index
    %c0_66 = arith.constant 0 : index
    %107 = vector.load %arg10[%c0_64, %c3, %c0_65, %c0_66] : memref<1x4x8x8xf32, #tpu.memory_space<vmem>>, vector<1x1x8x8xf32>
    %108 = vector.shape_cast %107 : vector<1x1x8x8xf32> to vector<1x8x8xf32>
    %109 = vector.shape_cast %105 : vector<1x8x8xf32> to vector<1x1x8x8xf32>
    tpu.vector_store %arg10[%c0_64, %c3, %c0_65, %c0_66], %109 {strides = array<i32>} : memref<1x4x8x8xf32, #tpu.memory_space<vmem>>, vector<1x1x8x8xf32>,
    %c0_67 = arith.constant 0 : index
    %c0_68 = arith.constant 0 : index
    %c96 = arith.constant 96 : index
    %110 = vector.load %arg8[%c0_67, %c0_68, %c96] : memref<1x8x128xf32, #tpu.memory_space<vmem>>, vector<1x8x32xf32>
    tpu.vector_store %arg8[%c0_67, %c0_68, %c96], %106 {strides = array<i32>} : memref<1x8x128xf32, #tpu.memory_space<vmem>>, vector<1x8x32xf32>,
    %cst_69 = arith.constant dense<0.000000e+00> : vector<1x32xf32>
    %111 = vector.multi_reduction <add>, %106, %cst_69 [1] : vector<1x8x32xf32> to vector<1x32xf32>
    %112 = vector.shape_cast %111 : vector<1x32xf32> to vector<1x1x32xf32>
    %cst_70 = arith.constant 1.250000e-01 : f32
    %113 = vector.broadcast %cst_70 : f32 to vector<1x1x32xf32>
    %114 = arith.mulf %112, %113 : vector<1x1x32xf32>
    %c0_71 = arith.constant 0 : index
    %c0_72 = arith.constant 0 : index
    %c96_73 = arith.constant 96 : index
    %115 = vector.load %arg9[%c0_71, %c0_72, %c96_73] : memref<1x1x128xf32, #tpu.memory_space<vmem>>, vector<1x1x32xf32>
    tpu.vector_store %arg9[%c0_71, %c0_72, %c96_73], %114 {strides = array<i32>} : memref<1x1x128xf32, #tpu.memory_space<vmem>>, vector<1x1x32xf32>,
    return
  }
  func.func @transform_0(%arg0: i32) -> (i32, i32, i32) {
    %c0_i32 = arith.constant 0 : i32
    %c0_i32_0 = arith.constant 0 : i32
    %c0_i32_1 = arith.constant 0 : i32
    return %arg0, %c0_i32, %c0_i32_0 : i32, i32, i32
  }
  func.func @transform_1(%arg0: i32) -> (i32, i32) {
    %c0_i32 = arith.constant 0 : i32
    %c0_i32_0 = arith.constant 0 : i32
    %c0_i32_1 = arith.constant 0 : i32
    return %c0_i32, %c0_i32_0 : i32, i32
  }
  func.func @transform_2(%arg0: i32) -> (i32, i32) {
    %c0_i32 = arith.constant 0 : i32
    %c0_i32_0 = arith.constant 0 : i32
    %c0_i32_1 = arith.constant 0 : i32
    return %c0_i32, %c0_i32_0 : i32, i32
  }
  func.func @transform_3(%arg0: i32) -> (i32, i32) {
    %c0_i32 = arith.constant 0 : i32
    %c0_i32_0 = arith.constant 0 : i32
    %c0_i32_1 = arith.constant 0 : i32
    return %c0_i32, %c0_i32_0 : i32, i32
  }
  func.func @transform_4(%arg0: i32) -> (i32, i32) {
    %c0_i32 = arith.constant 0 : i32
    %c0_i32_0 = arith.constant 0 : i32
    %c0_i32_1 = arith.constant 0 : i32
    return %c0_i32, %c0_i32_0 : i32, i32
  }
  func.func @transform_5(%arg0: i32) -> (i32, i32) {
    %c0_i32 = arith.constant 0 : i32
    %c0_i32_0 = arith.constant 0 : i32
    %c0_i32_1 = arith.constant 0 : i32
    return %c0_i32, %c0_i32_0 : i32, i32
  }
  func.func @transform_6(%arg0: i32) -> (i32, i32) {
    %c0_i32 = arith.constant 0 : i32
    %c0_i32_0 = arith.constant 0 : i32
    %c0_i32_1 = arith.constant 0 : i32
    return %c0_i32, %c0_i32_0 : i32, i32
  }
  func.func @transform_7(%arg0: i32) -> (i32, i32, i32) {
    %c0_i32 = arith.constant 0 : i32
    %c0_i32_0 = arith.constant 0 : i32
    %c0_i32_1 = arith.constant 0 : i32
    return %arg0, %c0_i32, %c0_i32_0 : i32, i32, i32
  }
  func.func @transform_8(%arg0: i32) -> (i32, i32, i32) {
    %c0_i32 = arith.constant 0 : i32
    %c0_i32_0 = arith.constant 0 : i32
    %c0_i32_1 = arith.constant 0 : i32
    return %arg0, %c0_i32, %c0_i32_0 : i32, i32, i32
  }
  func.func @transform_9(%arg0: i32) -> (i32, i32, i32, i32) {
    %c0_i32 = arith.constant 0 : i32
    %c0_i32_0 = arith.constant 0 : i32
    %c0_i32_1 = arith.constant 0 : i32
    %c0_i32_2 = arith.constant 0 : i32
    return %arg0, %c0_i32, %c0_i32_0, %c0_i32_1 : i32, i32, i32, i32
  }
}

</mosaic_0001>

<bundles_post_ra>
// kernel: tpu_custom_call.1
= control target key start
LH: loop header
LB: loop body
LE: loop exit
PB: predicated region body
PF: predicated region fallthrough
CT: control target
= control target key end

     0   :  { %s2649_s0 = inlined_call_operand.hbm [shape: f32[2,8,32], index: 0, kind: input, shape index: {}]   ;;  %s2650_s1 = inlined_call_operand.hbm [shape: f32[32,128], index: 1, kind: input, shape index: {}]   ;;  %s2651_s2 = inlined_call_operand.hbm [shape: f32[32,128], index: 2, kind: input, shape index: {}]   ;;  %s2652_s3 = inlined_call_operand.hbm [shape: f32[32,128], index: 3, kind: input, shape index: {}]   ;;  %s2653_s4 = inlined_call_operand.vmem [shape: f32[1,128], index: 4, kind: input, shape index: {}]   ;;  %s2654_s5 = inlined_call_operand.vmem [shape: f32[1,128], index: 5, kind: input, shape index: {}]   ;;  %s2655_s6 = inlined_call_operand.vmem [shape: f32[1,128], index: 6, kind: input, shape index: {}]   ;;  %s2656_s7 = inlined_call_operand.hbm [shape: f32[2,8,128], index: 7, kind: output, shape index: {0}]   ;;  %s2657_s8 = inlined_call_operand.hbm [shape: f32[2,1,128], index: 8, kind: output, shape index: {1}]   ;;  %s2658_s9 = inlined_call_operand.hbm [shape: f32[2,4,8,8], index: 9, kind: output, shape index: {2}]  }
   0x1   :  { %2666 = sst [smem:[#allocation21_spill]] %s2649_s0 }
   0x2   :  { %2667 = sst [smem:[#allocation22_spill]] %s2650_s1 }
   0x3   :  { %2668 = sst [smem:[#allocation23_spill]] %s2651_s2 }
   0x4   :  { %2669 = sst [smem:[#allocation24_spill]] %s2658_s9 }
   0x5   :  { %15 = vsyncpa [#allocation3], 0 }
   0x6   :  { %17 = vsyncpa [#allocation3 + $0x1], 0 }
   0x7   :  { %18 = vsyncpa [#allocation6], 0 }
   0x8   :  { %19 = vsyncpa [#allocation9], 0 }
   0x9   :  { %20 = vsyncpa [#allocation4], 0 }
   0xa   :  { %22 = vsyncpa [#allocation4 + $0x1], 0 }
   0xb   :  { %23 = vsyncpa [#allocation12], 0 }
   0xc   :  { %25 = vsyncpa [#allocation12 + $0x1], 0  ;;  %s2197_s30 = smov 0   ;;  %s2199_s10 = smov 0  }
   0xd   :  { %s2201_s11 = smov 0   ;;  %s2203_s12 = smov 0  }
   0xe LB: > { %2670 = sst [smem:[#allocation19_spill]] %s2116_s30  ;;  %s2218_s13 = sadd.s32 4294967295, %s2128_s12   ;;  %s2128_s12 = sphi %s2203_s12, %s2698_s12   ;;  %s2124_s11 = sphi %s2201_s11, %s2697_s11   ;;  %s2120_s10 = sphi %s2199_s10, %s2696_s10   ;;  %s2116_s30 = sphi %s2197_s30, %s2695_s30  }
   0xf   : > { %s2660_s14 = sadd.s32 4294967294, %s2128_s12   ;;  %p51_p0 = scmp.ne.s32.totalorder %s2120_s10, %s2116_s30 }
  0x10   : > { %p2659_p1 = scmp.eq.s32.totalorder %s2218_s13, 0  ;;  %p207_p3 = scmp.eq.s32.totalorder %s2660_s14, 1 }
  0x11   : > { %p1601_p5 = scmp.ge.s32.totalorder %s2128_s12, 1  ;;  %p266_p7 = scmp.lt.s32.totalorder %s2128_s12, 3 }
  0x12   : > { %p2229_p4 = por %p2659_p1, %p51_p0  ;;  %p2234_p6 = por %p207_p3, %p51_p0 }
  0x13   : > { %p2239_p8 = pnand %p1601_p5, %p266_p7  ;;  %s2130_s18 = smov [#allocation5]  }
  0x14   : > { %s2671_s15 = scalar_select %p2229_p4, 1, 0 }
  0x15   : > { %s2672_s16 = scalar_select %p2234_p6, 1, 0 }
  0x16   : > { %s2674_s17 = scalar_select %p2239_p8, 1, 0 }
  0x17   : > { %2673 = sst [smem:[#allocation20_spill]] %s2672_s16  ;;  %s278_s19 = sshll.u32 %s2130_s18, 4  ;;  %s2243_s19 = int_to_ptr.vmem [resolvable:$true] %s278_s19 }
  0x18   : > { %p1787_p9 = pneg %p2239_p8  ;;  %s2131_s21 = smov [#allocation7]  }
  0x19   : > { %s291_s22 = sshll.u32 %s2131_s21, 4  ;;  %s2132_s23 = smov [#allocation8]   ;;  %s2254_s22 = int_to_ptr.vmem [resolvable:$true] %s291_s22 }
  0x1a   : > { %p2250_p11 = pnand %p1787_p9, %p2659_p1  ;;  %s2256_s24 = sshll.u32 %s2132_s23, 4  ;;  %s305_s24 = int_to_ptr.vmem [resolvable:$true] %s2256_s24 }
  0x1b   : > { %s2676_s1 = sld [smem:[#allocation22_spill]] }
  0x1c   : > { %p2266_p13 = pneg %p2250_p11 }
  0x21   : > { %s1880_s27 = scalar_lea.hbm %s2676_s1, 512 }
  0x22   : > { %p1881_p12 = scmp.ne.s32.totalorder %s2676_s1, %s1880_s27  ;;  %p1887_p5 = scmp.lt.u32.totalorder %s1880_s27, %s2676_s1 }
  0x24   : > { %p1883_p0 = pnand %p2266_p13, %p1881_p12 }
  0x26   : > { %p1884_p3 = pneg %p1883_p0 }
  0x28   : > { %p1889_p7 = pnand %p1887_p5, %p1884_p3 }
  0x2a   : > { %1892 = shalt.err (!%p1889_p7)
}
  0x2b   : > { %s1893_s25 = scalar_lea.vmem %s2243_s19, 512  ;;  %p1901_p2 = scmp.lt.s32.totalorder %s2243_s19, %s2243_s19 }
  0x2c   : > { %p1894_p9 = scmp.ne.s32.totalorder %s2243_s19, %s1893_s25  ;;  %p1902_p6 = scmp.lt.s32.totalorder %s1893_s25, %s1893_s25 }
  0x2e   : > { %p1896_p10 = pnand %p1894_p9, %p2266_p13  ;;  %p1903_p12 = por %p1902_p6, %p1901_p2 }
  0x30   : > { %p1897_p1 = pneg %p1896_p10 }
  0x32   : > { %p1904_p0 = pnand %p1903_p12, %p1897_p1 }
  0x34   : > { %1907 = shalt.err (!%p1904_p0)
}
  0x35   : > { %s2133_s26 = smov 128   ;;  %s2134_s27 = smov 8  }
  0x36   : > { %1790 = dma.hbm_to_vmem [thread:$0]  (!%p2250_p11), %s2676_s1, 512, %s2243_s19, [#allocation6], %s2133_s26, %s2133_s26, %s2134_s27  }
  0x37   : > { %s2678_s2 = sld [smem:[#allocation23_spill]] }
  0x3d   : > { %s1908_s25 = scalar_lea.hbm %s2678_s2, 512 }
  0x3e   : > { %p1909_p1 = scmp.ne.s32.totalorder %s2678_s2, %s1908_s25  ;;  %p1915_p10 = scmp.lt.u32.totalorder %s1908_s25, %s2678_s2 }
  0x40   : > { %p1911_p2 = pnand %p1909_p1, %p2266_p13 }
  0x42   : > { %p1912_p6 = pneg %p1911_p2 }
  0x44   : > { %p1917_p3 = pnand %p1915_p10, %p1912_p6 }
  0x46   : > { %1920 = shalt.err (!%p1917_p3)
}
  0x47   : > { %s1921_s19 = scalar_lea.vmem %s2254_s22, 512  ;;  %p1929_p12 = scmp.lt.s32.totalorder %s2254_s22, %s2254_s22 }
  0x48   : > { %p1922_p5 = scmp.ne.s32.totalorder %s2254_s22, %s1921_s19  ;;  %p1930_p0 = scmp.lt.s32.totalorder %s1921_s19, %s1921_s19 }
  0x4a   : > { %p1924_p7 = pnand %p1922_p5, %p2266_p13  ;;  %p1931_p1 = por %p1930_p0, %p1929_p12 }
  0x4c   : > { %p1925_p9 = pneg %p1924_p7 }
  0x4e   : > { %p1932_p2 = pnand %p1931_p1, %p1925_p9 }
  0x50   : > { %1935 = shalt.err (!%p1932_p2)
}
  0x51   : > { %1793 = dma.hbm_to_vmem [thread:$0]  (!%p2250_p11), %s2678_s2, 512, %s2254_s22, [#allocation6], %s2133_s26, %s2133_s26, %s2134_s27  }
  0x52   : > { %s1936_s28 = scalar_lea.hbm %s2652_s3, 512 }
  0x53   : > { %p1937_p6 = scmp.ne.s32.totalorder %s2652_s3, %s1936_s28  ;;  %p1943_p5 = scmp.lt.u32.totalorder %s1936_s28, %s2652_s3 }
  0x55   : > { %p1939_p10 = pnand %p1937_p6, %p2266_p13 }
  0x57   : > { %p1940_p3 = pneg %p1939_p10 }
  0x59   : > { %p1945_p7 = pnand %p1943_p5, %p1940_p3 }
  0x5b   : > { %1948 = shalt.err (!%p1945_p7)
}
  0x5c   : > { %s1949_s19 = scalar_lea.vmem %s305_s24, 512  ;;  %p1957_p1 = scmp.lt.s32.totalorder %s305_s24, %s305_s24 }
  0x5d   : > { %p1950_p9 = scmp.ne.s32.totalorder %s305_s24, %s1949_s19  ;;  %p1958_p2 = scmp.lt.s32.totalorder %s1949_s19, %s1949_s19 }
  0x5f   : > { %p1952_p12 = pnand %p1950_p9, %p2266_p13  ;;  %p1959_p4 = por %p1958_p2, %p1957_p1 }
  0x61   : > { %p1953_p0 = pneg %p1952_p12 }
  0x63   : > { %p1960_p8 = pnand %p1959_p4, %p1953_p0 }
  0x65   : > { %1963 = shalt.err (!%p1960_p8)
}
  0x66   : > { %1796 = dma.hbm_to_vmem [thread:$0]  (!%p2250_p11), %s2652_s3, 512, %s305_s24, [#allocation9], %s2133_s26, %s2133_s26, %s2134_s27  }
  0x67   : > { %s2339_s18 = sadd.s32 1, %s2128_s12   ;;  %s38_s30 = sadd.s32 1, %s2124_s11 }
  0x68   : > { %s35_s20 = ssub.s32 %s2128_s12, %s2339_s18  ;;  %p45_p8 = scmp.ne.s32.totalorder %s2124_s11, %s2120_s10 }
  0x69   : > { %p36_p4 = scmp.eq.s32.totalorder %s35_s20, 0  ;;  %p46_p13 = scmp.eq.s32.totalorder %s2128_s12, 0 }
  0x6a   : > { %p1814_p6 = scmp.lt.s32.totalorder %s2128_s12, 2  ;;  %p2679_p3 = scmp.eq.s32.totalorder %s2218_s13, 1 }
  0x6b   : > { %s2349_s14 = scalar_select %p36_p4, %s2124_s11, %s38_s30  }
  0x6c   : > { %p47_p10 = por %p46_p13, %p45_p8  ;;  %p2353_p5 = por %p2679_p3, %p45_p8 }
  0x6d   : > { %s327_s28 = sand.u32 1, %s2124_s11   ;;  %s1607_s29 = sshll.u32 %s2128_s12, 7 }
  0x6e   : > { %s1606_s24 = sshll.u32 %s327_s28, 3  ;;  %s2681_s0 = sld [smem:[#allocation21_spill]] }
  0x6f   : > { %s331_s23 = scalar_lea.vmem [#allocation2], %s1606_s24  ;;  %p2364_p11 = pnand %p1814_p6, %p47_p10 }
  0x70   : > { %s338_s25 = sshll.u32 %s331_s23, 4  ;;  %s328_s22 = scalar_lea.sflag [#allocation3], %s327_s28  ;;  %s2368_s25 = int_to_ptr.vmem [resolvable:$true] %s338_s25 }
  0x71   : > { %p1966_p9 = pneg %p2364_p11 }
  0x74   : > { %s2362_s21 = scalar_lea.hbm %s2681_s0, %s1607_s29  ;;  %s1969_s29 = scalar_lea.hbm %s2681_s0, 256 }
  0x75   : > { %s1964_s9 = scalar_lea.hbm %s2362_s21, 128  ;;  %p1970_p1 = scmp.lt.u32.totalorder %s2362_s21, %s2681_s0 }
  0x76   : > { %p1965_p7 = scmp.ne.s32.totalorder %s2362_s21, %s1964_s9  ;;  %p1971_p2 = scmp.lt.u32.totalorder %s1969_s29, %s1964_s9 }
  0x77   : > { %p1973_p8 = scmp.lt.u32.totalorder %s1964_s9, %s2362_s21 }
  0x78   : > { %p1967_p12 = pnand %p1966_p9, %p1965_p7  ;;  %p1972_p4 = por %p1971_p2, %p1970_p1 }
  0x7a   : > { %p1968_p0 = pneg %p1967_p12  ;;  %p1974_p13 = por %p1973_p8, %p1972_p4 }
  0x7c   : > { %p1975_p6 = pnand %p1974_p13, %p1968_p0 }
  0x7e   : > { %1978 = shalt.err (!%p1975_p6)
}
  0x7f   : > { %s1979_s28 = scalar_lea.vmem %s2368_s25, 128  ;;  %s2135_s27 = smov [#allocation2]  }
  0x80   : > { %p1980_p10 = scmp.ne.s32.totalorder %s2368_s25, %s1979_s28  ;;  %s1984_s23 = sshll.u32 %s2135_s27, 4  ;;  %s1985_s23 = int_to_ptr.vmem [resolvable:$false] %s1984_s23 }
  0x81   : > { %s1986_s20 = scalar_lea.vmem %s1985_s23, 256  ;;  %p1987_p12 = scmp.lt.s32.totalorder %s2368_s25, %s1985_s23 }
  0x82   : > { %p1982_p3 = pnand %p1980_p10, %p1966_p9  ;;  %p1988_p1 = scmp.lt.s32.totalorder %s1986_s20, %s1979_s28 }
  0x84   : > { %p1983_p7 = pneg %p1982_p3  ;;  %p1989_p2 = por %p1988_p1, %p1987_p12 }
  0x86   : > { %p1990_p4 = pnand %p1989_p2, %p1983_p7 }
  0x88   : > { %1993 = shalt.err (!%p1990_p4)
}
  0x89   : > { %1800 = dma.hbm_to_vmem [thread:$0]  (!%p2364_p11), %s2362_s21, 128, %s2368_s25, %s328_s22  }
  0x8a   : > { %p2683_p0 = scmp.ne.s32.totalorder %s2674_s17, 0 }
  0x8b   : > { %s2398_s9 = sand.u32 (!%p2683_p0), 1, %s2120_s10   ;;  %p2684_p9 = scmp.ne.s32.totalorder (!%p2683_p0), %s2671_s15, 0 }
  0x8c   : > { %347 = sbr.rel (%p2683_p0) target bundleno = 1437 (0x59d), region = 48  ;;  %s1609_s30 = sshll.u32 (!%p2683_p0), %s2398_s9, 3 }
  0x8d   : > { %s350_s29 = scalar_lea.sflag (!%p2683_p0), [#allocation3], %s2398_s9  ;;  %s2404_s24 = scalar_lea.vmem (!%p2683_p0), [#allocation2], %s1609_s30 }
  0x93   : > { %2095 = dma.done.wait (%p2684_p9), %s350_s29, 128  }
  0x94   : > { %2097 = vsyncadd (%p2684_p9), %s350_s29, 4294967168  ;;  %p2685_p11 = scmp.eq.s32.totalorder %s2218_s13, 0 }
  0x96   : > { %2099 = dma.done.wait (%p2685_p11), [#allocation6], 1024   ;;  %p2686_p8 = pmov %p2685_p11 }
  0x98   : > { %2101 = vsyncadd (%p2686_p8), [#allocation6], 4294966272  ;;  %p2687_p13 = pmov %p2686_p8 }
  0x99   : > { %p2688_p6 = pmov %p2686_p8 }
  0x9a   : > { %2103 = dma.done.wait (%p2687_p13), [#allocation9], 512  }
  0x9b   : > { %2105 = vsyncadd (%p2688_p6), [#allocation9], 4294966784  ;;  %v2136_v0 = vmov 0.0|0.0   ;;  %vm2137_vm0 = vmmov 0   ;;  %v2138_v1 = vmov 0.0   ;;  %v414_v2 = vld [vmem:[#allocation7] sm:$0xff] }
  0x9c   : > { %1755 = vmatprep.subr.bf16.mxu1 %v2136_v0  ;;  %1749 = vmatprep.subr.bf16.mxu0 %v2136_v0  ;;  %v415_v3 = vld [vmem:[#allocation7 + $0x8] sm:$0xff]  ;;  %v410_v4 = vld [vmem:[#allocation5] sm:$0xff]  ;;  %v416_v7 = vld [vmem:[#allocation7 + $0x10] sm:$0xff]  ;;  %vm429_vm1 = vcmask 261120   ;;  %s2139_s19 = smov 64   ;;  %s2140_s22 = smov 96  }
  0x9d   : > { %1695 = vmatprep.mubr.msk.f32.mxu1 %vm2137_vm0, %v2138_v1  ;;  %1684 = vmatprep.mubr.msk.f32.mxu0 %vm2137_vm0, %v2138_v1  ;;  %v1756_v5 = vpack.c.bf16 %v415_v3, %v414_v2  ;;  %v411_v6 = vld [vmem:[#allocation5 + $0x8] sm:$0xff]  ;;  %v417_v8 = vld [vmem:[#allocation7 + $0x18] sm:$0xff]  ;;  %v412_v10 = vld [vmem:[#allocation5 + $0x10] sm:$0xff]  ;;  %s2141_s26 = smov 32   ;;  %vm733_vm2 = vcmask 64512   ;;  %s1614_s23 = sshll.u32 %s2398_s9, 5 }
  0x9e   : > { %v1750_v9 = vpack.c.bf16 %v411_v6, %v410_v4  ;;  %v413_v11 = vld [vmem:[#allocation5 + $0x18] sm:$0xff]  ;;  %v1759_v12 = vpack.c.bf16 %v417_v8, %v416_v7  ;;  %v418_v15 = vld [vmem:[#allocation8] sm:$0xff]  ;;  %v419_v16 = vld [vmem:[#allocation8 + $0x8] sm:$0xff]  ;;  %s2485_s20 = scalar_lea.vmem [#allocation13], %s1614_s23  ;;  %s2509_s29 = scalar_lea.vmem [#allocation10], %s1609_s30  ;;  %vm828_vm3 = vcmask 253952  }
  0x9f   : > { %1757 = vmatpush3.bf16.msra.mxu1 %v1756_v5  ;;  %v1753_v13 = vpack.c.bf16 %v413_v11, %v412_v10  ;;  %v409_v14 = vld [vmem:[%s2404_s24] sm:$0xff]  ;;  %v1762_v18 = vpack.c.bf16 %v419_v16, %v418_v15  ;;  %s2515_s24 = scalar_lea.vmem [#allocation11], %s2398_s9  ;;  %vm1002_vm4 = vcmask 523520   ;;  %vm1189_vm5 = vcmask 785920   ;;  %s1397_s30 = sand.u32 1, %s2218_s13  }
  0xa0   : > { %1751 = vmatpush3.bf16.msra.mxu0 %v1750_v9  ;;  %1758 = vmatprep.subr.bf16.mxu1 %v2136_v0  ;;  %v420_v17 = vld [vmem:[#allocation8 + $0x10] sm:$0xff]  ;;  %v421_v19 = vld [vmem:[#allocation8 + $0x18] sm:$0xff]  ;;  %vm1016_vm6 = vcmask 516352   ;;  %s1639_s15 = sshll.u32 %s2218_s13, 4  ;;  %vm1203_vm7 = vcmask 778752   ;;  %s1644_s28 = sshll.u32 %s2218_s13, 9 }
  0xa1   : > { %1752 = vmatprep.subr.bf16.mxu0 %v2136_v0  ;;  %v1765_v20 = vpack.c.bf16 %v421_v19, %v420_v17  ;;  %v1617_v21 = vld [vmem:[%s2654_s5] ss:$0 sm:$0xff]  ;;  %s2535_s25 = scalar_lea.hbm %s2657_s8, %s1639_s15  ;;  %s1441_s27 = sshll.u32 %s2485_s20, 4  ;;  %vm1390_vm8 = vcmask 1041152   ;;  %vm1376_vm9 = vcmask 1048320   ;;  %s2557_s27 = int_to_ptr.vmem [resolvable:$true] %s1441_s27 }
  0xa2   : > { %v1615_v23 = vld [vmem:[%s2653_s4] ss:$0 sm:$0xff]  ;;  %s2689_s0 = sld [smem:[#allocation24_spill]]  ;;  %s2561_s1 = scalar_lea.sflag [#allocation12], %s1397_s30 }
  0xa3   : > { %1760 = vmatpush3.bf16.msra.mxu1 %v1759_v12  ;;  %v1619_v29 = vld [vmem:[%s2655_s6] ss:$0 sm:$0xff] }
  0xa4   : > { %1754 = vmatpush3.bf16.msra.mxu0 %v1753_v13  ;;  %1709 = vmatprep.subr.mxu1 %v2138_v1 }
  0xa5   : > { %1761 = vmatprep.subr.bf16.mxu0 %v2136_v0 }
  0xa6   : > { %1696 = vmatmul.mubr.msk.f32.vlgmr.msra.gmra.mrb[0].mxu1 %vm429_vm1, %v409_v14 }
  0xa7   : > { %1685 = vmatmul.mubr.msk.f32.vlgmr.msra.gmra.mrb[0].mxu0 %vm429_vm1, %v409_v14  ;;  %1711 = vmatprep.mubr.msk.f32.mxu1 %vm2137_vm0, %v2138_v1 }
  0xa8   : > { %1706 = vmatprep.mubr.msk.f32.mxu0 %vm2137_vm0, %v2138_v1  ;;  %1763 = vmatpush3.bf16.msra.mxu0 %v1762_v18 }
  0xa9   : > { %1764 = vmatprep.subr.bf16.mxu0 %v2136_v0 }
  0xac   : > { %1766 = vmatpush3.bf16.msra.mxu0 %v1765_v20 }
  0xad   : > { %1719 = vmatprep.subr.mxu0 %v2138_v1 }
  0xaf   : > { %1707 = vmatmul.mubr.msk.f32.vlgmr.msra.gmra.mrb[2].mxu0 %vm429_vm1, %v409_v14 }
  0xb0   : > { %1721 = vmatprep.mubr.msk.f32.mxu0 %vm2137_vm0, %v2138_v1 }
 0x179   : > { %v576_v22 = vpop.f32.mrb[0].mxu1 }
 0x17a   : > { %v577_v24 = vadd.f32 %v1617_v21, %v576_v22  ;;  %v1697_v25 = vpop.f32.mrb[1].mxu1  ;;  %v499_v26 = vpop.f32.mrb[0].mxu0 }
 0x17b   : > { %v1686_v27 = vpop.f32.mrb[1].mxu0  ;;  %v500_v28 = vadd.f32 %v1615_v23, %v499_v26 }
 0x17c   : > { %1020 = vrot.lane.b32.xlu1 %v577_v24, %s2139_s19  ;;  %832 = vrot.lane.b32.xlu0 %v577_v24, %s2140_s22 }
 0x17d   : > { %1710 = vmatpush3.xpose.msk.msra.mxu1 %vm429_vm1, %v577_v24 }
 0x17e   : > { %1714 = vmatprep.subr.mxu1 %v2138_v1 }
 0x180   : > { %1712 = vmatmul.mubr.msk.f32.vlgmr.msra.gmra.mrb[2].mxu1 %vm429_vm1, %v500_v28  ;;  %1018 = vrot.lane.b32.xlu1 %v500_v28, %s2139_s19 }
 0x181   : > { %830 = vrot.lane.b32.xlu0 %v500_v28, %s2140_s22  ;;  %1716 = vmatprep.mubr.msk.f32.mxu1 %vm2137_vm0, %v2138_v1 }
 0x182   : > { %v653_v30 = vpop.f32.mrb[2].mxu0 }
 0x183   : > { %v2454_v31 = vadd.f32 %v1619_v29, %v653_v30  ;;  %v1708_v32 = vpop.f32.mrb[3].mxu0 }
 0x184   : > { %1205 = vrot.lane.b32.xlu1 %v500_v28, %s2141_s26 }
 0x185   : > { %1207 = vrot.lane.b32.xlu0 %v577_v24, %s2141_s26  ;;  %1715 = vmatpush3.msra.mxu1 %v2454_v31 }
 0x186   : > { %1724 = vmatprep.subr.mxu1 %v2138_v1 }
 0x1ee   : > { %v833_v33 = vpop.permute.xlu0 %832  ;;  %v1021_v34 = vpop.permute.xlu1 %1020 }
 0x1ef   : > { %1720 = vmatpush3.xpose.msk.msra.mxu0 %vm429_vm1, %v833_v33 }
 0x1f0   : > { %1729 = vmatprep.subr.mxu0 %v2138_v1 }
 0x1f2   : > { %v1019_v36 = vpop.permute.xlu1 %1018 }
 0x1f3   : > { %v831_v35 = vpop.permute.xlu0 %830 }
 0x1f4   : > { %1722 = vmatmul.mubr.msk.f32.vlgmr.msra.gmra.mrb[4].mxu0 %vm429_vm1, %v831_v35 }
 0x1f5   : > { %1730 = vmatpush3.xpose.msk.msra.mxu0 %vm429_vm1, %v1021_v34  ;;  %1731 = vmatprep.mubr.msk.f32.mxu0 %vm2137_vm0, %v2138_v1 }
 0x1f6   : > { %1739 = vmatprep.subr.mxu0 %v2138_v1  ;;  %v1206_v38 = vpop.permute.xlu1 %1205 }
 0x1f7   : > { %v1208_v37 = vpop.permute.xlu0 %1207 }
 0x1f8   : > { %1732 = vmatmul.mubr.msk.f32.vlgmr.msra.gmra.mrb[6].mxu0 %vm429_vm1, %v1019_v36 }
 0x1f9   : > { %1740 = vmatpush3.xpose.msk.msra.mxu0 %vm429_vm1, %v1208_v37  ;;  %1741 = vmatprep.mubr.msk.f32.mxu0 %vm2137_vm0, %v2138_v1 }
 0x1fc   : > { %1742 = vmatmul.mubr.msk.f32.vlgmr.msra.gmra.mrb[8].mxu0 %vm429_vm1, %v1206_v38 }
 0x253   : > { %v729_v39 = vpop.f32.mrb[2].mxu1 }
 0x254   : > { %v1713_v40 = vpop.f32.mrb[3].mxu1  ;;  %v734_v41 = vsel %vm733_vm2, %v729_v39, -inf }
 0x255   : > { %735 = vmax.xlane.f32.xlu0 %v734_v41 }
 0x2c7   : > { %v904_v42 = vpop.f32.mrb[4].mxu0 }
 0x2c8   : > { %v1723_v43 = vpop.f32.mrb[5].mxu0  ;;  %v908_v44 = vsel %vm733_vm2, %v904_v42, -inf }
 0x2c9   : > { %909 = vmax.xlane.f32.xlu1 %v908_v44 }
 0x2cb   : > { %v1092_v45 = vpop.f32.mrb[6].mxu0 }
 0x2cc   : > { %v1733_v46 = vpop.f32.mrb[7].mxu0  ;;  %v1096_v47 = vsel %vm733_vm2, %v1092_v45, -inf }
 0x2cd   : > { %1097 = vmax.xlane.f32.xlu0 %v1096_v47 }
 0x2cf   : > { %v1279_v48 = vpop.f32.mrb[8].mxu0 }
 0x2d0   : > { %v1743_v49 = vpop.f32.mrb[9].mxu0  ;;  %v1283_v50 = vsel %vm733_vm2, %v1279_v48, -inf }
 0x2d1   : > { %1284 = vmax.xlane.f32.xlu0 %v1283_v50 }
 0x2da   : > { %920 = vrot.lane.b32.xlu1 %v2454_v31, %s2140_s22 }
 0x2e2   : > { %v736_v51 = vpop.xlane.xlu0 %735 }
 0x2e3   : > { %v737_v52 = vsub.f32 %v729_v39, %v736_v51 }
 0x2e5   : > { %v738_v53 = vmul.f32 1.442695, %v737_v52 }
 0x2e7   : > { %1864 = vpow2.f32 %v738_v53 }
 0x2f1   : > { %v1865_v54 = vpop.eup %1864 }
 0x2f2   : > { %v740_v55 = vsel %vm733_vm2, %v1865_v54, 0.0 }
 0x2fe   : > { %741 = vadd.xlane.f32.xlu1 %v740_v55 }
 0x356   : > { %v910_v56 = vpop.xlane.xlu1 %909 }
 0x357   : > { %v911_v57 = vsub.f32 %v904_v42, %v910_v56 }
 0x359   : > { %v912_v58 = vmul.f32 1.442695, %v911_v57 }
 0x35a   : > { %v1098_v59 = vpop.xlane.xlu0 %1097  ;;  %v921_v8 = vpop.permute.xlu1 %920 }
 0x35b   : > { %1866 = vpow2.f32 %v912_v58  ;;  %v1099_v60 = vsub.f32 %v1092_v45, %v1098_v59 }
 0x35d   : > { %v1100_v61 = vmul.f32 1.442695, %v1099_v60 }
 0x35e   : > { %v1285_v62 = vpop.xlane.xlu0 %1284 }
 0x35f   : > { %1868 = vpow2.f32 %v1100_v61  ;;  %v1286_v63 = vsub.f32 %v1279_v48, %v1285_v62 }
 0x361   : > { %v1287_v0 = vmul.f32 1.442695, %v1286_v63 }
 0x363   : > { %1870 = vpow2.f32 %v1287_v0 }
 0x365   : > { %v1867_v2 = vpop.eup %1866 }
 0x366   : > { %v914_v3 = vsel %vm733_vm2, %v1867_v2, 0.0 }
 0x367   : > { %915 = vadd.xlane.f32.xlu0 %v914_v3 }
 0x369   : > { %v1869_v4 = vpop.eup %1868 }
 0x36a   : > { %v1102_v5 = vsel %vm733_vm2, %v1869_v4, 0.0 }
 0x36b   : > { %1103 = vadd.xlane.f32.xlu1 %v1102_v5 }
 0x36d   : > { %v1871_v6 = vpop.eup %1870 }
 0x36e   : > { %v1289_v7 = vsel %vm733_vm2, %v1871_v6, 0.0 }
 0x36f   : > { %1290 = vadd.xlane.f32.xlu0 %v1289_v7 }
 0x37c   : > { %1294 = vrot.lane.b32.xlu1 %v2454_v31, %s2141_s26 }
 0x385   : > { %1107 = vrot.lane.b32.xlu0 %v2454_v31, %s2139_s19 }
 0x38b   : > { %v742_v9 = vpop.xlane.xlu1 %741 }
 0x38c   : > { %1872 = vrcp.f32 %v742_v9 }
 0x396   : > { %v1873_v10 = vpop.eup %1872 }
 0x397   : > { %v744_v11 = vmul.f32 %v1873_v10, %v1865_v54 }
 0x399   : > { %818 = vst.msk [vmem:[%s2485_s20] sm:$0xff] %vm733_vm2, %v744_v11  ;;  %1717 = vmatmul.mubr.msk.f32.vlgmr.msra.gmra.mrb[4].mxu1 %vm733_vm2, %v744_v11 }
 0x39a   : > { %1725 = vmatpush3.msra.mxu1 %v921_v8  ;;  %1726 = vmatprep.mubr.msk.f32.mxu1 %vm2137_vm0, %v2138_v1 }
 0x39b   : > { %1734 = vmatprep.subr.mxu1 %v2138_v1 }
 0x3f4   : > { %v916_v12 = vpop.xlane.xlu0 %915 }
 0x3f5   : > { %1874 = vrcp.f32 %v916_v12 }
 0x3f8   : > { %v1104_v13 = vpop.xlane.xlu1 %1103 }
 0x3f9   : > { %1876 = vrcp.f32 %v1104_v13 }
 0x3fc   : > { %v1291_v14 = vpop.xlane.xlu0 %1290  ;;  %v1295_v20 = vpop.permute.xlu1 %1294 }
 0x3fd   : > { %1878 = vrcp.f32 %v1291_v14 }
 0x3ff   : > { %v1875_v15 = vpop.eup %1874 }
 0x400   : > { %v918_v16 = vmul.f32 %v1875_v15, %v1867_v2  ;;  %v1108_v17 = vpop.permute.xlu0 %1107 }
 0x402   : > { %1627 = vst.msk [vmem:[%s2485_s20 + $0x8] sm:$0xff] %vm733_vm2, %v918_v16  ;;  %1727 = vmatmul.mubr.msk.f32.vlgmr.msra.gmra.mrb[6].mxu1 %vm733_vm2, %v918_v16 }
 0x403   : > { %v1877_v18 = vpop.eup %1876  ;;  %1735 = vmatpush3.msra.mxu1 %v1108_v17  ;;  %1736 = vmatprep.mubr.msk.f32.mxu1 %vm2137_vm0, %v2138_v1 }
 0x404   : > { %v1106_v19 = vmul.f32 %v1877_v18, %v1869_v4  ;;  %1744 = vmatprep.subr.mxu1 %v2138_v1 }
 0x406   : > { %1631 = vst.msk [vmem:[%s2485_s20 + $0x10] sm:$0xff] %vm733_vm2, %v1106_v19  ;;  %1737 = vmatmul.mubr.msk.f32.vlgmr.msra.gmra.mrb[8].mxu1 %vm733_vm2, %v1106_v19 }
 0x407   : > { %v1879_v21 = vpop.eup %1878  ;;  %1745 = vmatpush3.msra.mxu1 %v1295_v20  ;;  %1746 = vmatprep.mubr.msk.f32.mxu1 %vm2137_vm0, %v2138_v1 }
 0x408   : > { %v1293_v22 = vmul.f32 %v1879_v21, %v1871_v6 }
 0x40a   : > { %1635 = vst.msk [vmem:[%s2485_s20 + $0x18] sm:$0xff] %vm733_vm2, %v1293_v22  ;;  %1747 = vmatmul.mubr.msk.f32.vlgmr.msra.gmra.mrb[10].mxu1 %vm733_vm2, %v1293_v22  ;;  %s2555_s20 = scalar_lea.hbm %s2689_s0, %s1644_s28 }
 0x46c   : > { %v814_v23 = vpop.f32.mrb[4].mxu1 }
 0x46d   : > { %819 = vst.msk [vmem:[%s2509_s29] sm:$0xff] %vm429_vm1, %v814_v23  ;;  %v820_v24 = vsel %vm429_vm1, %v814_v23, 0.0  ;;  %v1718_v25 = vpop.f32.mrb[5].mxu1 }
 0x46e   : > { %v821_v26 = vrot.slane %v820_v24, 4 }
 0x470   : > { %v822_v27 = vadd.f32 %v821_v26, %v820_v24 }
 0x472   : > { %v823_v28 = vrot.slane %v822_v27, 2 }
 0x474   : > { %v824_v1 = vadd.f32 %v823_v28, %v822_v27 }
 0x476   : > { %v825_v29 = vrot.slane %v824_v1, 1 }
 0x478   : > { %v826_v30 = vadd.f32 %v825_v29, %v824_v1 }
 0x47a   : > { %v827_v31 = vmul.f32 0.125, %v826_v30 }
 0x47c   : > { %829 = vst.msk [vmem:[%s2515_s24] sm:$0x1] %vm828_vm3, %v827_v31 }
 0x4d5   : > { %v992_v32 = vpop.f32.mrb[6].mxu1 }
 0x4d6   : > { %v1004_v33 = vsel %vm429_vm1, %v992_v32, 0.0  ;;  %999 = vrot.lane.b32.xlu1 %v992_v32, %s2141_s26  ;;  %v1728_v34 = vpop.f32.mrb[7].mxu1 }
 0x4d7   : > { %v1005_v35 = vrot.slane %v1004_v33, 4 }
 0x4d9   : > { %v1006_v36 = vadd.f32 %v1005_v35, %v1004_v33  ;;  %v1179_v37 = vpop.f32.mrb[8].mxu1 }
 0x4da   : > { %v1191_v38 = vsel %vm429_vm1, %v1179_v37, 0.0  ;;  %1186 = vrot.lane.b32.xlu1 %v1179_v37, %s2139_s19  ;;  %v1738_v39 = vpop.f32.mrb[9].mxu1 }
 0x4db   : > { %v1007_v40 = vrot.slane %v1006_v36, 2  ;;  %v1192_v41 = vrot.slane %v1191_v38, 4 }
 0x4dd   : > { %v1008_v42 = vadd.f32 %v1007_v40, %v1006_v36  ;;  %v1193_v43 = vadd.f32 %v1192_v41, %v1191_v38  ;;  %v1366_v44 = vpop.f32.mrb[10].mxu1 }
 0x4de   : > { %v1378_v45 = vsel %vm429_vm1, %v1366_v44, 0.0  ;;  %v1748_v46 = vpop.f32.mrb[11].mxu1 }
 0x4df   : > { %v1194_v47 = vrot.slane %v1193_v43, 2  ;;  %v1379_v48 = vrot.slane %v1378_v45, 4  ;;  %v1009_v49 = vrot.slane %v1008_v42, 1 }
 0x4e1   : > { %v1195_v50 = vadd.f32 %v1194_v47, %v1193_v43  ;;  %v1380_v51 = vadd.f32 %v1379_v48, %v1378_v45  ;;  %v1010_v52 = vadd.f32 %v1009_v49, %v1008_v42 }
 0x4e3   : > { %v1381_v53 = vrot.slane %v1380_v51, 2  ;;  %v1011_v54 = vmul.f32 0.125, %v1010_v52  ;;  %v1196_v55 = vrot.slane %v1195_v50, 1 }
 0x4e5   : > { %v1382_v56 = vadd.f32 %v1381_v53, %v1380_v51  ;;  %1013 = vrot.lane.b32.xlu0 %v1011_v54, %s2141_s26  ;;  %v1197_v57 = vadd.f32 %v1196_v55, %v1195_v50  ;;  %s1415_s26 = sshll.u32 %s2509_s29, 4  ;;  %s2550_s26 = int_to_ptr.vmem [resolvable:$true] %s1415_s26 }
 0x4e7   : > { %v1198_v58 = vmul.f32 0.125, %v1197_v57  ;;  %v1383_v59 = vrot.slane %v1382_v56, 1 }
 0x4e9   : > { %1200 = vrot.lane.b32.xlu0 %v1198_v58, %s2139_s19  ;;  %v1384_v60 = vadd.f32 %v1383_v59, %v1382_v56  ;;  %s1428_s19 = sshll.u32 %s2515_s24, 4  ;;  %s2543_s19 = int_to_ptr.vmem [resolvable:$true] %s1428_s19 }
 0x4ea   : > { %s1994_s2 = scalar_lea.vmem %s2543_s19, 16 }
 0x4eb   : > { %v1385_v61 = vmul.f32 0.125, %v1384_v60  ;;  %p1995_p10 = scmp.ne.s32.totalorder %s2543_s19, %s1994_s2 }
 0x4ed   : > { %1373 = vrot.lane.b32.xlu0 %v1366_v44, %s2140_s22  ;;  %1387 = vrot.lane.b32.xlu1 %v1385_v61, %s2140_s22  ;;  %s1638_s22 = sshll.u32 %s2218_s13, 7  ;;  %p1996_p3 = pnand %p1995_p10, %p2353_p5 }
 0x4ee   : > { %s2548_s15 = scalar_lea.hbm %s2656_s7, %s1638_s22  ;;  %s2142_s22 = smov [#allocation11]  }
 0x4ef   : > { %p1997_p7 = pneg %p1996_p3  ;;  %s1998_s23 = sshll.u32 %s2142_s22, 4  ;;  %s1999_s23 = int_to_ptr.vmem [resolvable:$false] %s1998_s23 }
 0x4f0   : > { %s2000_s17 = scalar_lea.vmem %s1999_s23, 32  ;;  %p2001_p12 = scmp.lt.s32.totalorder %s2543_s19, %s1999_s23 }
 0x4f1   : > { %p2002_p1 = scmp.lt.s32.totalorder %s2000_s17, %s1994_s2 }
 0x4f3   : > { %p2003_p2 = por %p2002_p1, %p2001_p12 }
 0x4f5   : > { %p2004_p4 = pnand %p2003_p2, %p1997_p7 }
 0x548   : > { %v1000_v62 = vpop.permute.xlu1 %999 }
 0x549   : > { %1003 = vst.msk [vmem:[%s2509_s29] sm:$0xff] %vm1002_vm4, %v1000_v62 }
 0x54c   : > { %v1187_v63 = vpop.permute.xlu1 %1186 }
 0x54d   : > { %1190 = vst.msk [vmem:[%s2509_s29] sm:$0xff] %vm1189_vm5, %v1187_v63 }
 0x557   : > { %v1014_v0 = vpop.permute.xlu0 %1013 }
 0x558   : > { %1017 = vst.msk [vmem:[%s2515_s24] sm:$0x1] %vm1016_vm6, %v1014_v0 }
 0x55b   : > { %v1201_v2 = vpop.permute.xlu0 %1200 }
 0x55c   : > { %1204 = vst.msk [vmem:[%s2515_s24] sm:$0x1] %vm1203_vm7, %v1201_v2 }
 0x55f   : > { %v1388_v3 = vpop.permute.xlu1 %1387  ;;  %v1374_v4 = vpop.permute.xlu0 %1373 }
 0x560   : > { %1391 = vst.msk [vmem:[%s2515_s24] sm:$0x1] %vm1390_vm8, %v1388_v3 }
 0x561   : > { %1377 = vst.msk [vmem:[%s2509_s29] sm:$0xff] %vm1376_vm9, %v1374_v4 }
 0x562   : > { %2007 = shalt.err (!%p2004_p4)
}
 0x563   : > { %s2008_s29 = scalar_lea.hbm %s2535_s25, 16  ;;  %s2012_s28 = scalar_lea.hbm %s2657_s8, 32 }
 0x564   : > { %p2009_p0 = scmp.ne.s32.totalorder %s2535_s25, %s2008_s29  ;;  %p2013_p8 = scmp.lt.u32.totalorder %s2535_s25, %s2657_s8 }
 0x565   : > { %p2014_p13 = scmp.lt.u32.totalorder %s2012_s28, %s2008_s29  ;;  %p2016_p10 = scmp.lt.u32.totalorder %s2008_s29, %s2535_s25 }
 0x566   : > { %p2010_p9 = pnand %p2009_p0, %p2353_p5 }
 0x567   : > { %p2015_p6 = por %p2014_p13, %p2013_p8 }
 0x568   : > { %p2011_p11 = pneg %p2010_p9 }
 0x569   : > { %p2017_p3 = por %p2016_p10, %p2015_p6 }
 0x56b   : > { %p2018_p7 = pnand %p2017_p3, %p2011_p11 }
 0x56d   : > { %2021 = shalt.err (!%p2018_p7)
}
 0x56e   : > { %1782 = dma.vmem_to_hbm [thread:$0]  (%p2353_p5), %s2543_s19, 16, %s2535_s25, %s2561_s1  }
 0x56f   : > { %s1393_s2 = scalar_lea.sflag [#allocation4], %s2398_s9  ;;  %s2022_s22 = scalar_lea.vmem %s2550_s26, 128 }
 0x570   : > { %p2023_p12 = scmp.ne.s32.totalorder %s2550_s26, %s2022_s22  ;;  %s2143_s23 = smov [#allocation10]  }
 0x571   : > { %s2026_s17 = sshll.u32 %s2143_s23, 4  ;;  %s2027_s17 = int_to_ptr.vmem [resolvable:$false] %s2026_s17 }
 0x572   : > { %p2024_p1 = pnand %p2023_p12, %p2353_p5  ;;  %s2028_s29 = scalar_lea.vmem %s2027_s17, 256 }
 0x573   : > { %p2029_p4 = scmp.lt.s32.totalorder %s2550_s26, %s2027_s17  ;;  %p2030_p0 = scmp.lt.s32.totalorder %s2028_s29, %s2022_s22 }
 0x574   : > { %p2025_p2 = pneg %p2024_p1 }
 0x575   : > { %p2031_p9 = por %p2030_p0, %p2029_p4 }
 0x577   : > { %p2032_p11 = pnand %p2031_p9, %p2025_p2 }
 0x579   : > { %2035 = shalt.err (!%p2032_p11)
}
 0x57a   : > { %s2036_s9 = scalar_lea.hbm %s2548_s15, 128  ;;  %s2040_s24 = scalar_lea.hbm %s2656_s7, 256 }
 0x57b   : > { %p2037_p8 = scmp.ne.s32.totalorder %s2548_s15, %s2036_s9  ;;  %p2041_p10 = scmp.lt.u32.totalorder %s2548_s15, %s2656_s7 }
 0x57c   : > { %p2042_p3 = scmp.lt.u32.totalorder %s2040_s24, %s2036_s9  ;;  %p2044_p12 = scmp.lt.u32.totalorder %s2036_s9, %s2548_s15 }
 0x57d   : > { %p2038_p13 = pnand %p2037_p8, %p2353_p5 }
 0x57e   : > { %p2043_p7 = por %p2042_p3, %p2041_p10 }
 0x57f   : > { %p2039_p6 = pneg %p2038_p13 }
 0x580   : > { %p2045_p1 = por %p2044_p12, %p2043_p7 }
 0x582   : > { %p2046_p2 = pnand %p2045_p1, %p2039_p6 }
 0x584   : > { %2049 = shalt.err (!%p2046_p2)
}
 0x585   : > { %1781 = dma.vmem_to_hbm [thread:$0]  (%p2353_p5), %s2550_s26, 128, %s2548_s15, %s1393_s2  }
 0x586   : > { %s2050_s21 = scalar_lea.vmem %s2557_s27, 512  ;;  %s2144_s13 = smov [#allocation13]  }
 0x587   : > { %p2051_p4 = scmp.ne.s32.totalorder %s2557_s27, %s2050_s21  ;;  %s2054_s22 = sshll.u32 %s2144_s13, 4  ;;  %s2055_s22 = int_to_ptr.vmem [resolvable:$false] %s2054_s22 }
 0x588   : > { %s2056_s23 = scalar_lea.vmem %s2055_s22, 1024  ;;  %p2057_p11 = scmp.lt.s32.totalorder %s2557_s27, %s2055_s22 }
 0x589   : > { %p2052_p0 = pnand %p2051_p4, %p2353_p5  ;;  %p2058_p8 = scmp.lt.s32.totalorder %s2056_s23, %s2050_s21 }
 0x58b   : > { %p2053_p9 = pneg %p2052_p0  ;;  %p2059_p13 = por %p2058_p8, %p2057_p11 }
 0x58d   : > { %p2060_p6 = pnand %p2059_p13, %p2053_p9 }
 0x58f   : > { %2063 = shalt.err (!%p2060_p6)
}
 0x590   : > { %s2064_s26 = scalar_lea.hbm %s2555_s20, 512  ;;  %s2068_s17 = scalar_lea.hbm %s2689_s0, 1024 }
 0x591   : > { %p2065_p10 = scmp.ne.s32.totalorder %s2555_s20, %s2064_s26  ;;  %p2069_p12 = scmp.lt.u32.totalorder %s2555_s20, %s2689_s0 }
 0x592   : > { %p2070_p1 = scmp.lt.u32.totalorder %s2068_s17, %s2064_s26  ;;  %p2072_p4 = scmp.lt.u32.totalorder %s2064_s26, %s2555_s20 }
 0x593   : > { %p2066_p3 = pnand %p2065_p10, %p2353_p5 }
 0x594   : > { %p2071_p2 = por %p2070_p1, %p2069_p12 }
 0x595   : > { %p2067_p7 = pneg %p2066_p3 }
 0x596   : > { %p2073_p0 = por %p2072_p4, %p2071_p2 }
 0x598   : > { %p2074_p9 = pnand %p2073_p0, %p2067_p7 }
 0x59a   : > { %2077 = shalt.err (!%p2074_p9)
}
 0x59b   : > { %s2145_s25 = smov 128   ;;  %s2146_s19 = smov 8  }
 0x59c   : > { %1783 = dma.vmem_to_hbm [thread:$0]  (%p2353_p5), %s2557_s27, 512, %s2555_s20, %s2561_s1, %s2145_s25, %s2145_s25, %s2146_s19  }
 0x59d PF: > { %s2690_s24 = sld [smem:[#allocation19_spill]]  ;;  %s2691_s30 = sld [smem:[#allocation20_spill]] }
 0x59e   : > { %p2693_p8 = scmp.ge.s32.totalorder %s2128_s12, 2 }
 0x5a3   : > { %s1456_s28 = sand.u32 1, %s2690_s24   ;;  %p2692_p11 = scmp.ne.s32.totalorder %s2691_s30, 0 }
 0x5a4   : > { %s1457_s21 = scalar_lea.sflag [#allocation4], %s1456_s28 }
 0x5a5   : > { %p1802_p13 = pnand %p2693_p8, %p2692_p11 }
 0x5a7   : > { %2107 = dma.done.wait (!%p1802_p13), %s1457_s21, 128  }
 0x5a8   : > { %2109 = vsyncadd (!%p1802_p13), %s1457_s21, 4294967168  ;;  %s2694_s13 = sadd.s32 4294967294, %s2128_s12  }
 0x5a9   : > { %s1465_s22 = sand.u32 1, %s2694_s13  }
 0x5aa   : > { %s1466_s23 = scalar_lea.sflag [#allocation12], %s1465_s22 }
 0x5ab   : > { %2111 = dma.done.wait (!%p1802_p13), %s1466_s23, 528  }
 0x5ac   : > { %2113 = vsyncadd (!%p1802_p13), %s1466_s23, 4294966768  ;;  %p28_p5 = scmp.ge.s32.totalorder %s2339_s18, 4   ;;  %s2695_s30 = smov %s2120_s10 }
 0x5ad   : > { %s2696_s10 = smov %s2124_s11  ;;  %s2697_s11 = smov %s2349_s14 }
 0x5ae   : > { %s2698_s12 = smov %s2339_s18  ;;  %30 = sbr.rel (!%p28_p5) target bundleno = 14 (0xe), region = 140 }
 0x5b5   :  { %1479 = vsyncpa [#allocation3], 1 }
 0x5b6   :  { %1481 = vsyncpa [#allocation3 + $0x1], 1 }
 0x5b7   :  { %1482 = vsyncpa [#allocation6], 1 }
 0x5b8   :  { %1483 = vsyncpa [#allocation9], 1 }
 0x5b9   :  { %1484 = vsyncpa [#allocation4], 1 }
 0x5ba   :  { %1486 = vsyncpa [#allocation4 + $0x1], 1 }
 0x5bb   :  { %1487 = vsyncpa [#allocation12], 1 }
 0x5bc   :  { %1489 = vsyncpa [#allocation12 + $0x1], 1 }

</bundles_post_ra>
